<compile_context>
chip_gen: v7x
topology: tpu7x:2x2x1
jax: 0.10.0
libtpu: 0.0.40
codegen_flags: <defaults>
</compile_context>

<pallas_src>
import functools
import math

import jax
import jax.numpy as jnp
from jax import lax
from jax.experimental import pallas as pl
from jax.experimental.pallas import tpu as pltpu

MAX_SPOTS = 8            # PyTorch draws random.randint(3, 8) spots.
LANES = 128              # TPU lane width; last block dim is kept lane-dense.
TILE_ROWS_CAP = 512      # flat 128-wide rows per grid step (~768 KiB/operand block).
STRIP_ROWS = 128         # strip-mining granularity inside a block (64 KiB temps).
TILE_PIX_NAT = 128 * 256 # pixels per grid step for the natural (W % 128 == 0) layout.
_NEG_LARGE = -1e30       # finite sentinel for log(intensity) of disabled spots.


def _burn_mask(x, y, spots_ref, nsp_ref, *, e_min, inv_range, mask_dtype):
    """Channel-invariant burn mask (un-scaled by burn intensity) for one strip.

    x, y      : f32 [rows, cols] normalized coordinates in [-1, 1]
    spots_ref : SMEM f32 [MAX_SPOTS*4] packed (spot_x, spot_y, -1/radius, log(intensity))
    nsp_ref   : SMEM i32 [1] number of active spots (first nsp entries of the table)
    """
    x = x.astype(mask_dtype)
    y = y.astype(mask_dtype)
    dist = jnp.sqrt(x * x + y * y)

    # edge_weight = exp(2*(dist-0.7)), min-max normalized with analytic global
    # constants (corners are always the max; the grid point nearest the origin
    # is known analytically) -- no in-kernel reductions, exact per-tile math.
    edge = (jnp.exp(2.0 * (dist - 0.7)) - e_min) * inv_range

    # Burn spots: exp is monotonic, so max_s exp(d_s*(-1/r_s))*i_s
    # == exp(max_s (d_s*(-1/r_s) + log i_s)).  One exp total, and the loop only
    # runs over the num_spots active spots (dynamic trip count).
    def body(s, m):
        sx = spots_ref[4 * s + 0].astype(mask_dtype)
        sy = spots_ref[4 * s + 1].astype(mask_dtype)
        neg_inv_r = spots_ref[4 * s + 2].astype(mask_dtype)
        log_si = spots_ref[4 * s + 3].astype(mask_dtype)
        dx = x - sx
        dy = y - sy
        sd = jnp.sqrt(dx * dx + dy * dy)
        return jnp.maximum(m, sd * neg_inv_r + log_si)

    n = nsp_ref[0]
    init = jnp.full(x.shape, _NEG_LARGE, mask_dtype)
    max_exp = lax.fori_loop(0, n, body, init)
    spots = jnp.exp(max_exp)          # exp(-1e30) == 0, matching the "no spot" case

    return jnp.maximum(edge, spots).astype(jnp.float32)


def _burn_kernel_flat(spots_ref, nsp_ref, burn_ref, img_ref, out_ref, *,
                      H, W, tile_rows, strip_rows, e_min, inv_range, mask_dtype):
    """Flat lane-dense layout: one grid step == (3, tile_rows, 128) flat pixels."""
    t = pl.program_id(0)
    b = burn_ref[0]
    f_r = b * 0.2                      # channel 0: darkening factor 0.8
    f_gb = b * 0.5                     # channels 1, 2: darkening factor 0.5
    y_step = 2.0 / max(H - 1, 1)       # linspace(-1,1,N)[i] = -1 + i*2/(N-1)
    x_step = 2.0 / max(W - 1, 1)
    n_strips = tile_rows // strip_rows

    def process(strip_i):
        r0 = strip_i * strip_rows
        if not isinstance(strip_i, int):
            r0 = pl.multiple_of(r0, strip_rows)
        base = t * (tile_rows * LANES) + r0 * LANES
        sub = lax.broadcasted_iota(jnp.int32, (strip_rows, LANES), 0)
        lane = lax.broadcasted_iota(jnp.int32, (strip_rows, LANES), 1)
        flat = base + sub * LANES + lane          # flat pixel index (row-major H*W)

        # Reconstruct (row, col) without vector integer division.
        if W & (W - 1) == 0:                      # power-of-two width: shift / mask
            shift = W.bit_length() - 1
            y_i = jnp.right_shift(flat, shift)
            x_i = jnp.bitwise_and(flat, W - 1)
        else:                                     # float estimate + exact +/-1 fixup
            # Exact while row index < ~5M (error in ROWS is ~3*row*2^-24);
            # fine for any realistic image.
            y_i = jnp.floor(flat.astype(jnp.float32) * (1.0 / W)).astype(jnp.int32)
            x_i = flat - y_i * W
            lo = x_i < 0
            y_i = jnp.where(lo, y_i - 1, y_i)
            x_i = jnp.where(lo, x_i + W, x_i)
            hi = x_i >= W
            y_i = jnp.where(hi, y_i + 1, y_i)
            x_i = jnp.where(hi, x_i - W, x_i)

        y = y_i.astype(jnp.float32) * y_step - 1.0
        x = x_i.astype(jnp.float32) * x_step - 1.0
        bm = _burn_mask(x, y, spots_ref, nsp_ref,
                        e_min=e_min, inv_range=inv_range, mask_dtype=mask_dtype)

        # result = img*(1 - bm*b) + (img*factor)*(bm*b) == img*(1 - bm*b*(1-factor))
        m_r = 1.0 - bm * f_r
        m_gb = 1.0 - bm * f_gb
        rows = pl.ds(r0, strip_rows)
        out_ref[0, rows, :] = img_ref[0, rows, :] * m_r
        out_ref[1, rows, :] = img_ref[1, rows, :] * m_gb
        out_ref[2, rows, :] = img_ref[2, rows, :] * m_gb

    if n_strips == 1:
        process(0)
    else:
        @pl.loop(0, n_strips)                     # bounds live ranges (vs Python for)
        def _(i):
            process(i)


def _burn_kernel_natural(spots_ref, nsp_ref, burn_ref, img_ref, out_ref, *,
                         H, W, tile_h, e_min, inv_range, mask_dtype):
    """Natural layout for W % 128 == 0: one grid step == (3, tile_h, W) pixels.

    x comes straight from the lane iota and y from sublane iota + program_id,
    so there is no flat-index reconstruction at all.
    """
    t = pl.program_id(0)
    b = burn_ref[0]
    f_r = b * 0.2
    f_gb = b * 0.5
    y_step = 2.0 / max(H - 1, 1)
    x_step = 2.0 / max(W - 1, 1)

    row0 = t * tile_h
    ri = lax.broadcasted_iota(jnp.int32, (tile_h, W), 0)
    ci = lax.broadcasted_iota(jnp.int32, (tile_h, W), 1)
    y = (row0 + ri).astype(jnp.float32) * y_step - 1.0
    x = ci.astype(jnp.float32) * x_step - 1.0
    bm = _burn_mask(x, y, spots_ref, nsp_ref,
                    e_min=e_min, inv_range=inv_range, mask_dtype=mask_dtype)
    m_r = 1.0 - bm * f_r
    m_gb = 1.0 - bm * f_gb
    out_ref[0] = img_ref[0] * m_r
    out_ref[1] = img_ref[1] * m_gb
    out_ref[2] = img_ref[2] * m_gb


def _edge_norm_constants(H, W):
    """Analytic min-max constants of exp(2*(dist-0.7)) over the (H, W) grid."""
    def _min_abs(n):
        if n <= 1:
            return 1.0
        return 0.0 if n % 2 == 1 else 1.0 / (n - 1)
    d_min = math.sqrt(_min_abs(W) ** 2 + _min_abs(H) ** 2)
    d_max = math.sqrt(2.0)                     # corners |x| = |y| = 1
    e_min = math.exp(2.0 * (d_min - 0.7))
    e_max = math.exp(2.0 * (d_max - 0.7))
    return e_min, 1.0 / (e_max - e_min)


def pizza_burning_effect(img, spot_params, burn_intensity, num_spots,
                         mask_dtype=jnp.float32):
    """img: f32 [3, H, W]; spot_params: f32 [MAX_SPOTS, 4] = (x, y, radius, intensity)
    with the first `num_spots` rows active (others: intensity 0); burn_intensity: f32 [1].

    mask_dtype=jnp.bfloat16 roughly doubles VALU/EUP throughput on v6e/v7x but
    the mask error (~1e-3) exceeds the 2e-5 tolerance used in the self-test.
    """
    C, H, W = img.shape
    assert C == 3, "darkening factors are hard-coded for RGB (matches the PyTorch module)"
    e_min, inv_range = _edge_norm_constants(H, W)

    # Flat 1-D SMEM spot table (2-D SMEM [8,4] would pad to [8,128] words):
    # (x, y, -1/radius, log(intensity) or -1e30 sentinel).
    sx = spot_params[:, 0]
    sy = spot_params[:, 1]
    sr = spot_params[:, 2]
    si = spot_params[:, 3]
    log_si = jnp.where(si > 0, jnp.log(jnp.maximum(si, 1e-37)), _NEG_LARGE)
    spot_table = jnp.stack([sx, sy, -1.0 / sr, log_si], axis=1).reshape(-1).astype(jnp.float32)
    nsp = jnp.asarray(num_spots, jnp.int32).reshape(1)
    burn = jnp.asarray(burn_intensity, jnp.float32).reshape(1)

    smem_specs = [pl.BlockSpec(memory_space=pltpu.MemorySpace.SMEM)] * 3
    n_pix = H * W
    cost = pl.CostEstimate(
        flops=(12 * MAX_SPOTS + 40) * n_pix,
        transcendentals=(MAX_SPOTS + 3) * n_pix,
        bytes_accessed=2 * C * n_pix * 4,
    )
    cparams = pltpu.CompilerParams(dimension_semantics=("parallel",))

    if W % LANES == 0:
        # ---- Natural layout fast path: no flatten, no pad along the lane dim.
        rows_cap = max(8, TILE_PIX_NAT // W)
        if H <= rows_cap:
            grid_h, tile_h = 1, H
        else:
            grid_h = pl.cdiv(H, rows_cap)
            tile_h = ((pl.cdiv(H, grid_h) + 7) // 8) * 8   # sublane-aligned partial tiles
        H_pad = grid_h * tile_h
        img_p = img if H_pad == H else jnp.pad(img, ((0, 0), (0, H_pad - H), (0, 0)))

        kernel = functools.partial(
            _burn_kernel_natural, H=H, W=W, tile_h=tile_h,
            e_min=e_min, inv_range=inv_range, mask_dtype=mask_dtype)
        out = pl.pallas_call(
            kernel,
            out_shape=jax.ShapeDtypeStruct((C, H_pad, W), jnp.float32),
            grid_spec=pltpu.PrefetchScalarGridSpec(
                num_scalar_prefetch=0,
                grid=(grid_h,),
                in_specs=smem_specs + [pl.BlockSpec((C, tile_h, W), lambda t: (0, t, 0))],
                out_specs=pl.BlockSpec((C, tile_h, W), lambda t: (0, t, 0)),
            ),
            compiler_params=cparams,
            cost_estimate=cost,
        )(spot_table, nsp, burn, img_p)
        return out[:, :H, :]

    # ---- Flat lane-dense layout (arbitrary W): (C, n_rows, 128) flat pixels.
    n_rows = pl.cdiv(n_pix, LANES)
    grid_n = pl.cdiv(n_rows, TILE_ROWS_CAP)
    tile_rows = pl.cdiv(n_rows, grid_n)              # near-divisor: padding <= a few rows
    if grid_n > 1:
        tile_rows = ((tile_rows + 7) // 8) * 8       # sublane alignment for partial tiles
    n_rows_pad = grid_n * tile_rows
    strip_rows = STRIP_ROWS if (tile_rows > STRIP_ROWS and tile_rows % STRIP_ROWS == 0) \
        else tile_rows

    pad = n_rows_pad * LANES - n_pix
    img_flat = img.reshape(C, n_pix)
    if pad:
        img_flat = jnp.pad(img_flat, ((0, 0), (0, pad)))
    img_flat = img_flat.reshape(C, n_rows_pad, LANES)

    kernel = functools.partial(
        _burn_kernel_flat, H=H, W=W, tile_rows=tile_rows, strip_rows=strip_rows,
        e_min=e_min, inv_range=inv_range, mask_dtype=mask_dtype)
    out_flat = pl.pallas_call(
        kernel,
        out_shape=jax.ShapeDtypeStruct((C, n_rows_pad, LANES), jnp.float32),
        grid_spec=pltpu.PrefetchScalarGridSpec(
            num_scalar_prefetch=0,
            grid=(grid_n,),
            in_specs=smem_specs + [pl.BlockSpec((C, tile_rows, LANES), lambda t: (0, t, 0))],
            out_specs=pl.BlockSpec((C, tile_rows, LANES), lambda t: (0, t, 0)),
        ),
        compiler_params=cparams,
        cost_estimate=cost,
    )(spot_table, nsp, burn, img_flat)
    return out_flat.reshape(C, n_rows_pad * LANES)[:, :n_pix].reshape(C, H, W)


def _reference(img, spot_params, burn_intensity):
    """Pure-JAX reference mirroring the PyTorch forward."""
    C, H, W = img.shape
    y, x = jnp.meshgrid(jnp.linspace(-1.0, 1.0, H), jnp.linspace(-1.0, 1.0, W),
                        indexing="ij")
    dist = jnp.sqrt(x ** 2 + y ** 2)
    edge = jnp.exp(2.0 * (dist - 0.7))
    edge = (edge - edge.min()) / (edge.max() - edge.min())
    spots = jnp.zeros_like(dist)
    for s in range(MAX_SPOTS):
        sx, sy, sr, si = spot_params[s]
        sd = jnp.sqrt((x - sx) ** 2 + (y - sy) ** 2)
        spots = jnp.maximum(spots, jnp.exp(-sd / sr) * si)
    burn_mask = jnp.maximum(edge, spots) * burn_intensity[0]
    factor = jnp.array([0.8, 0.5, 0.5], jnp.float32).reshape(C, 1, 1)
    darkening = img * factor
    return img * (1.0 - burn_mask) + darkening * burn_mask


if __name__ == "__main__":
    key = jax.random.PRNGKey(0)
    k_burn, k_n, k_x, k_y, k_r, k_i, k_im0, k_im1, k_im2 = jax.random.split(key, 9)

    # Deterministic stand-ins for the python `random` draws in the module.
    burn_intensity = jax.random.uniform(
        k_burn, (1,), jnp.float32, minval=0.2, maxval=0.8)
    num_spots = jax.random.randint(k_n, (), 3, 9)   # random.randint(3, 8) inclusive
    spot_x = jax.random.uniform(k_x, (MAX_SPOTS,), jnp.float32, minval=-1.0, maxval=1.0)
    spot_y = jax.random.uniform(k_y, (MAX_SPOTS,), jnp.float32, minval=-1.0, maxval=1.0)
    spot_r = jax.random.uniform(k_r, (MAX_SPOTS,), jnp.float32, minval=0.05, maxval=0.2)
    spot_i = jax.random.uniform(k_i, (MAX_SPOTS,), jnp.float32, minval=0.5, maxval=1.0)
    # Spots beyond num_spots are disabled (intensity 0 / not iterated in-kernel).
    spot_i = spot_i * (jnp.arange(MAX_SPOTS) < num_spots).astype(jnp.float32)
    spot_params = jnp.stack([spot_x, spot_y, spot_r, spot_i], axis=1)  # [MAX_SPOTS, 4]

    # Exercise all three code paths at small shapes:
    #   power-of-two W (flat path, shift/mask), non-power-of-two W (flat path,
    #   float row/col reconstruction), and W % 128 == 0 (natural layout path).
    shapes = [(3, 16, 16), (3, 24, 20), (3, 16, 128)]
    for shape, k_img in zip(shapes, (k_im0, k_im1, k_im2)):
        img = jax.random.uniform(k_img, shape, dtype=jnp.float32)
        out = pizza_burning_effect(img, spot_params, burn_intensity, num_spots)
        out = jax.block_until_ready(out)
        ref = _reference(img, spot_params, burn_intensity)
        assert out.shape == shape and out.dtype == jnp.float32
        assert jnp.allclose(out, ref, atol=2e-5, rtol=2e-5), \
            f"mismatch vs pure-JAX reference for shape {shape}"

    print("KERNEL_OK")
</pallas_src>

<mosaic_0001>
module attributes {stable_mosaic.version = 11 : i64} {
  func.func @_burn_kernel_flat(%arg0: i32, %arg1: memref<32xf32, #tpu.memory_space<smem>>, %arg2: memref<1xi32, #tpu.memory_space<smem>>, %arg3: memref<1xf32, #tpu.memory_space<smem>>, %arg4: memref<3x2x128xf32, #tpu.memory_space<vmem>>, %arg5: memref<3x2x128xf32, #tpu.memory_space<vmem>>) attributes {dimension_semantics = [#tpu.dimension_semantics<parallel>], iteration_bounds = array<i64: 1>, scalar_prefetch = 0 : i64, scratch_operands = 0 : i64, tpu.core_type = #tpu.core_type<tc>, window_params = [{transform_indices = @transform_0, window_bounds = array<i64: 32>}, {transform_indices = @transform_1, window_bounds = array<i64: 1>}, {transform_indices = @transform_2, window_bounds = array<i64: 1>}, {transform_indices = @transform_3, window_bounds = array<i64: 3, 2, 128>}, {transform_indices = @transform_4, window_bounds = array<i64: 3, 2, 128>}]} {
    %c0 = arith.constant 0 : index
    %0 = memref.load %arg3[%c0] : memref<1xf32, #tpu.memory_space<smem>>
    %cst = arith.constant 2.000000e-01 : f32
    %1 = arith.mulf %0, %cst : f32
    %cst_0 = arith.constant 5.000000e-01 : f32
    %2 = arith.mulf %0, %cst_0 : f32
    %c256_i32 = arith.constant 256 : i32
    %3 = arith.muli %arg0, %c256_i32 : i32
    %c0_i32 = arith.constant 0 : i32
    %4 = arith.addi %3, %c0_i32 : i32
    %5 = tpu.iota {dimensions = array<i32: 0>} : vector<2x128xi32>
    %6 = tpu.iota {dimensions = array<i32: 1>} : vector<2x128xi32>
    %c128_i32 = arith.constant 128 : i32
    %7 = vector.broadcast %c128_i32 : i32 to vector<2x128xi32>
    %8 = arith.muli %5, %7 : vector<2x128xi32>
    %9 = vector.broadcast %4 : i32 to vector<2x128xi32>
    %10 = arith.addi %9, %8 : vector<2x128xi32>
    %11 = arith.addi %10, %6 : vector<2x128xi32>
    %c4_i32 = arith.constant 4 : i32
    %12 = vector.broadcast %c4_i32 : i32 to vector<2x128xi32>
    %13 = arith.shrsi %11, %12 : vector<2x128xi32>
    %c15_i32 = arith.constant 15 : i32
    %14 = vector.broadcast %c15_i32 : i32 to vector<2x128xi32>
    %15 = arith.andi %11, %14 : vector<2x128xi32>
    %16 = arith.sitofp %13 : vector<2x128xi32> to vector<2x128xf32>
    %cst_1 = arith.constant 0.13333334 : f32
    %17 = vector.broadcast %cst_1 : f32 to vector<2x128xf32>
    %18 = arith.mulf %16, %17 : vector<2x128xf32>
    %cst_2 = arith.constant 1.000000e+00 : f32
    %19 = vector.broadcast %cst_2 : f32 to vector<2x128xf32>
    %20 = arith.subf %18, %19 : vector<2x128xf32>
    %21 = arith.sitofp %15 : vector<2x128xi32> to vector<2x128xf32>
    %cst_3 = arith.constant 0.13333334 : f32
    %22 = vector.broadcast %cst_3 : f32 to vector<2x128xf32>
    %23 = arith.mulf %21, %22 : vector<2x128xf32>
    %cst_4 = arith.constant 1.000000e+00 : f32
    %24 = vector.broadcast %cst_4 : f32 to vector<2x128xf32>
    %25 = arith.subf %23, %24 : vector<2x128xf32>
    %26 = arith.mulf %25, %25 : vector<2x128xf32>
    %27 = arith.mulf %20, %20 : vector<2x128xf32>
    %28 = arith.addf %26, %27 : vector<2x128xf32>
    %29 = math.sqrt %28 : vector<2x128xf32>
    %cst_5 = arith.constant 0.699999988 : f32
    %30 = vector.broadcast %cst_5 : f32 to vector<2x128xf32>
    %31 = arith.subf %29, %30 : vector<2x128xf32>
    %cst_6 = arith.constant 2.000000e+00 : f32
    %32 = vector.broadcast %cst_6 : f32 to vector<2x128xf32>
    %33 = arith.mulf %32, %31 : vector<2x128xf32>
    %34 = math.exp %33 : vector<2x128xf32>
    %cst_7 = arith.constant 0.297768712 : f32
    %35 = vector.broadcast %cst_7 : f32 to vector<2x128xf32>
    %36 = arith.subf %34, %35 : vector<2x128xf32>
    %cst_8 = arith.constant 0.258106947 : f32
    %37 = vector.broadcast %cst_8 : f32 to vector<2x128xf32>
    %38 = arith.mulf %36, %37 : vector<2x128xf32>
    %c0_9 = arith.constant 0 : index
    %39 = memref.load %arg2[%c0_9] : memref<1xi32, #tpu.memory_space<smem>>
    %cst_10 = arith.constant -1.000000e+30 : f32
    %40 = vector.broadcast %cst_10 : f32 to vector<2x128xf32>
    %c0_i32_11 = arith.constant 0 : i32
    %41 = arith.subi %39, %c0_i32_11 : i32
    %42 = arith.addi %c0_i32_11, %41 : i32
    %c1_i32 = arith.constant 1 : i32
    %43 = scf.for %arg6 = %c0_i32_11 to %42 step %c1_i32 iter_args(%arg7 = %40) -> (vector<2x128xf32>)  : i32 {
      %c4_i32_30 = arith.constant 4 : i32
      %72 = arith.muli %c4_i32_30, %arg6 : i32
      %c0_i32_31 = arith.constant 0 : i32
      %73 = arith.addi %72, %c0_i32_31 : i32
      %74 = arith.index_cast %73 : i32 to index
      %75 = memref.load %arg1[%74] : memref<32xf32, #tpu.memory_space<smem>>
      %c4_i32_32 = arith.constant 4 : i32
      %76 = arith.muli %c4_i32_32, %arg6 : i32
      %c1_i32_33 = arith.constant 1 : i32
      %77 = arith.addi %76, %c1_i32_33 : i32
      %78 = arith.index_cast %77 : i32 to index
      %79 = memref.load %arg1[%78] : memref<32xf32, #tpu.memory_space<smem>>
      %c4_i32_34 = arith.constant 4 : i32
      %80 = arith.muli %c4_i32_34, %arg6 : i32
      %c2_i32 = arith.constant 2 : i32
      %81 = arith.addi %80, %c2_i32 : i32
      %82 = arith.index_cast %81 : i32 to index
      %83 = memref.load %arg1[%82] : memref<32xf32, #tpu.memory_space<smem>>
      %c4_i32_35 = arith.constant 4 : i32
      %84 = arith.muli %c4_i32_35, %arg6 : i32
      %c3_i32 = arith.constant 3 : i32
      %85 = arith.addi %84, %c3_i32 : i32
      %86 = arith.index_cast %85 : i32 to index
      %87 = memref.load %arg1[%86] : memref<32xf32, #tpu.memory_space<smem>>
      %88 = vector.broadcast %75 : f32 to vector<2x128xf32>
      %89 = arith.subf %25, %88 : vector<2x128xf32>
      %90 = vector.broadcast %79 : f32 to vector<2x128xf32>
      %91 = arith.subf %20, %90 : vector<2x128xf32>
      %92 = arith.mulf %89, %89 : vector<2x128xf32>
      %93 = arith.mulf %91, %91 : vector<2x128xf32>
      %94 = arith.addf %92, %93 : vector<2x128xf32>
      %95 = math.sqrt %94 : vector<2x128xf32>
      %96 = vector.broadcast %83 : f32 to vector<2x128xf32>
      %97 = arith.mulf %95, %96 : vector<2x128xf32>
      %98 = vector.broadcast %87 : f32 to vector<2x128xf32>
      %99 = arith.addf %97, %98 : vector<2x128xf32>
      %100 = arith.maximumf %arg7, %99 : vector<2x128xf32>
      scf.yield %100 : vector<2x128xf32>
    }
    %44 = math.exp %43 : vector<2x128xf32>
    %45 = arith.maximumf %38, %44 : vector<2x128xf32>
    %46 = vector.broadcast %1 : f32 to vector<2x128xf32>
    %47 = arith.mulf %45, %46 : vector<2x128xf32>
    %cst_12 = arith.constant 1.000000e+00 : f32
    %48 = vector.broadcast %cst_12 : f32 to vector<2x128xf32>
    %49 = arith.subf %48, %47 : vector<2x128xf32>
    %50 = vector.broadcast %2 : f32 to vector<2x128xf32>
    %51 = arith.mulf %45, %50 : vector<2x128xf32>
    %cst_13 = arith.constant 1.000000e+00 : f32
    %52 = vector.broadcast %cst_13 : f32 to vector<2x128xf32>
    %53 = arith.subf %52, %51 : vector<2x128xf32>
    %c0_14 = arith.constant 0 : index
    %c0_15 = arith.constant 0 : index
    %c0_16 = arith.constant 0 : index
    %54 = vector.load %arg4[%c0_14, %c0_15, %c0_16] : memref<3x2x128xf32, #tpu.memory_space<vmem>>, vector<1x2x128xf32>
    %55 = vector.shape_cast %54 : vector<1x2x128xf32> to vector<2x128xf32>
    %56 = arith.mulf %55, %49 : vector<2x128xf32>
    %c0_17 = arith.constant 0 : index
    %c0_18 = arith.constant 0 : index
    %c0_19 = arith.constant 0 : index
    %57 = vector.load %arg5[%c0_17, %c0_18, %c0_19] : memref<3x2x128xf32, #tpu.memory_space<vmem>>, vector<1x2x128xf32>
    %58 = vector.shape_cast %57 : vector<1x2x128xf32> to vector<2x128xf32>
    %59 = vector.shape_cast %56 : vector<2x128xf32> to vector<1x2x128xf32>
    tpu.vector_store %arg5[%c0_17, %c0_18, %c0_19], %59 {strides = array<i32>} : memref<3x2x128xf32, #tpu.memory_space<vmem>>, vector<1x2x128xf32>,
    %c1 = arith.constant 1 : index
    %c0_20 = arith.constant 0 : index
    %c0_21 = arith.constant 0 : index
    %60 = vector.load %arg4[%c1, %c0_20, %c0_21] : memref<3x2x128xf32, #tpu.memory_space<vmem>>, vector<1x2x128xf32>
    %61 = vector.shape_cast %60 : vector<1x2x128xf32> to vector<2x128xf32>
    %62 = arith.mulf %61, %53 : vector<2x128xf32>
    %c1_22 = arith.constant 1 : index
    %c0_23 = arith.constant 0 : index
    %c0_24 = arith.constant 0 : index
    %63 = vector.load %arg5[%c1_22, %c0_23, %c0_24] : memref<3x2x128xf32, #tpu.memory_space<vmem>>, vector<1x2x128xf32>
    %64 = vector.shape_cast %63 : vector<1x2x128xf32> to vector<2x128xf32>
    %65 = vector.shape_cast %62 : vector<2x128xf32> to vector<1x2x128xf32>
    tpu.vector_store %arg5[%c1_22, %c0_23, %c0_24], %65 {strides = array<i32>} : memref<3x2x128xf32, #tpu.memory_space<vmem>>, vector<1x2x128xf32>,
    %c2 = arith.constant 2 : index
    %c0_25 = arith.constant 0 : index
    %c0_26 = arith.constant 0 : index
    %66 = vector.load %arg4[%c2, %c0_25, %c0_26] : memref<3x2x128xf32, #tpu.memory_space<vmem>>, vector<1x2x128xf32>
    %67 = vector.shape_cast %66 : vector<1x2x128xf32> to vector<2x128xf32>
    %68 = arith.mulf %67, %53 : vector<2x128xf32>
    %c2_27 = arith.constant 2 : index
    %c0_28 = arith.constant 0 : index
    %c0_29 = arith.constant 0 : index
    %69 = vector.load %arg5[%c2_27, %c0_28, %c0_29] : memref<3x2x128xf32, #tpu.memory_space<vmem>>, vector<1x2x128xf32>
    %70 = vector.shape_cast %69 : vector<1x2x128xf32> to vector<2x128xf32>
    %71 = vector.shape_cast %68 : vector<2x128xf32> to vector<1x2x128xf32>
    tpu.vector_store %arg5[%c2_27, %c0_28, %c0_29], %71 {strides = array<i32>} : memref<3x2x128xf32, #tpu.memory_space<vmem>>, vector<1x2x128xf32>,
    return
  }
  func.func @transform_0(%arg0: i32) -> i32 {
    %c0_i32 = arith.constant 0 : i32
    %c0_i32_0 = arith.constant 0 : i32
    return %c0_i32 : i32
  }
  func.func @transform_1(%arg0: i32) -> i32 {
    %c0_i32 = arith.constant 0 : i32
    %c0_i32_0 = arith.constant 0 : i32
    return %c0_i32 : i32
  }
  func.func @transform_2(%arg0: i32) -> i32 {
    %c0_i32 = arith.constant 0 : i32
    %c0_i32_0 = arith.constant 0 : i32
    return %c0_i32 : i32
  }
  func.func @transform_3(%arg0: i32) -> (i32, i32, i32) {
    %c0_i32 = arith.constant 0 : i32
    %c0_i32_0 = arith.constant 0 : i32
    %c0_i32_1 = arith.constant 0 : i32
    return %c0_i32, %arg0, %c0_i32_0 : i32, i32, i32
  }
  func.func @transform_4(%arg0: i32) -> (i32, i32, i32) {
    %c0_i32 = arith.constant 0 : i32
    %c0_i32_0 = arith.constant 0 : i32
    %c0_i32_1 = arith.constant 0 : i32
    return %c0_i32, %arg0, %c0_i32_0 : i32, i32, i32
  }
}

</mosaic_0001>

<bundles_post_ra>
// kernel: tpu_custom_call.1
= control target key start
LH: loop header
LB: loop body
LE: loop exit
PB: predicated region body
PF: predicated region fallthrough
CT: control target
= control target key end

     0   :  { %11 = vsyncpa [#allocation6], 0  ;;  %s339_s0 = inlined_call_operand.vmem [shape: f32[32], index: 0, kind: input, shape index: {}]   ;;  %s340_s1 = inlined_call_operand.<no memory space> [shape: s32[1], index: 1, kind: input, shape index: {}]   ;;  %s341_s2 = inlined_call_operand.<no memory space> [shape: f32[1], index: 2, kind: input, shape index: {}]   ;;  %s342_s3 = inlined_call_operand.vmem [shape: f32[3,2,128], index: 3, kind: input, shape index: {}]   ;;  %s343_s4 = inlined_call_operand.hbm [shape: f32[3,2,128], index: 4, kind: output, shape index: {}]  }
   0x1   :  { %12 = vsyncpa [#allocation5], 0  ;;  %s19_s17 = sshll.u32 %s339_s0, 4  ;;  %s20_s17 = int_to_ptr.vmem [resolvable:$true] %s19_s17 }
   0x2   :  { %s195_s18 = scalar_lea.vmem %s20_s17, 16  ;;  %p200_p1 = scmp.lt.s32.totalorder %s20_s17, %s20_s17 }
   0x3   :  { %p196_p0 = scmp.ne.s32.totalorder %s20_s17, %s195_s18  ;;  %p201_p2 = scmp.lt.s32.totalorder %s195_s18, %s195_s18 }
   0x5   :  { %p202_p3 = por %p201_p2, %p200_p1 }
   0x7   :  { %p203_p4 = pnand %p202_p3, %p196_p0 }
   0x9   :  { %206 = shalt.err (!%p203_p4)
}
   0xa   :  { %s257_s19 = smov [#allocation4]  }
   0xb   :  { %22 = dma.vmem_to_smem %s20_s17, 16, %s257_s19, [#allocation6]  }
   0xc   :  { %241 = dma.done.wait [#allocation6], 16  }
   0xd   :  { %242 = vsyncadd [#allocation6], 4294967280 }
   0xe   :  { %32 = sfence }
   0xf   :  { %s34_s22 = smul.f32 0.2, %s341_s2  ;;  %v37_v0 = vlaneseq  ;;  %p155_p5 = scmp.le.s32.totalorder %s340_s1, 0  ;;  %v253_v27 = vmov -1e+30  }
  0x10   :  { %s35_s24 = smul.f32 0.5, %s341_s2  ;;  %v245_v28 = vmov (!%p155_p5), -1e+30   ;;  %s298_s27 = smov (!%p155_p5), 0  }
  0x11   :  { %v38_v1 = vshrl.u32 %v37_v0, 7  ;;  %v40_v2 = vand.u32 127, %v37_v0 }
  0x13   :  { %v41_v3 = vmul.u32 128, %v38_v1 }
  0x15   :  { %v44_v4 = vadd.s32 %v41_v3, %v40_v2 }
  0x17   :  { %v45_v5 = vshra.s32 %v44_v4, 4  ;;  %v46_v6 = vand.u32 15, %v44_v4 }
  0x19   :  { %v47_v7 = vcvt.s32.f32 %v45_v5  ;;  %v50_v8 = vcvt.s32.f32 %v46_v6 }
  0x1b   :  { %v48_v9 = vmul.f32 0.13333334, %v47_v7  ;;  %v51_v10 = vmul.f32 0.13333334, %v50_v8 }
  0x1d   :  { %v151_v11 = vadd.f32 -1.0, %v48_v9  ;;  %v152_v12 = vadd.f32 -1.0, %v51_v10 }
  0x1f   :  { %v53_v13 = vmul.f32 %v152_v12, %v152_v12  ;;  %v54_v14 = vmul.f32 %v151_v11, %v151_v11 }
  0x21   :  { %v55_v15 = vadd.f32 %v54_v14, %v53_v13 }
  0x23   :  { %187 = vrsqrt.f32 %v55_v15  ;;  %vm58_vm0 = vcmp.eq.f32.partialorder %v55_v15, inf  ;;  %v61_v17 = vand.u32 2147483648, %v55_v15  ;;  %vm60_vm1 = vcmp.eq.f32.partialorder %v55_v15, 0.0 }
  0x2d   :  { %v188_v16 = vpop.eup %187 }
  0x2e   :  { %v57_v18 = vmul.f32 %v188_v16, %v55_v15 }
  0x30   :  { %v59_v19 = vsel %vm58_vm0, %v55_v15, %v57_v18 }
  0x31   :  { %v62_v20 = vsel %vm60_vm1, %v61_v17, %v59_v19 }
  0x32   :  { %v153_v21 = vadd.f32 -0.7, %v62_v20 }
  0x34   :  { %v64_v22 = vmul.f32 2.0, %v153_v21 }
  0x36   :  { %v65_v23 = vmul.f32 1.442695, %v64_v22 }
  0x38   :  { %189 = vpow2.f32 %v65_v23 }
  0x3f   :  { %146 = sbr.rel (%p155_p5) target bundleno = 107 (0x6b), region = 45 }
  0x42   :  { %v190_v24 = vpop.eup %189 }
  0x43   :  { %v154_v25 = vadd.f32 -0.2977687, %v190_v24 }
  0x45   :  { %v68_v26 = vmul.f32 0.25810695, %v154_v25 }
  0x46 LB: > { %s156_s28 = sshll.u32 %s251_s27, 2  ;;  %s73_s27 = sadd.s32 1, %s251_s27   ;;  %s251_s27 = sphi %s298_s27, %s73_s27   ;;  %v247_v28 = vphi %v245_v28, %v246_v28  }
  0x47   : > { %s78_s29 = sld [smem:[#allocation4 + %s156_s28]]  ;;  %s79_s30 = sadd.s32 1, %s156_s28 }
  0x48   : > { %s80_s5 = sld [smem:[#allocation4 + %s79_s30]]  ;;  %s81_s6 = sadd.s32 2, %s156_s28 }
  0x49   : > { %s83_s7 = sadd.s32 3, %s156_s28  ;;  %s82_s8 = sld [smem:[#allocation4 + %s81_s6]] }
  0x4a   : > { %s84_s9 = sld [smem:[#allocation4 + %s83_s7]]  ;;  %p72_p6 = scmp.ge.s32.totalorder %s73_s27, %s340_s1 }
  0x4d   : > { %v85_v29 = vstv %s78_s29 }
  0x4e   : > { %v86_v30 = vsub.f32 %v152_v12, %v85_v29  ;;  %v87_v31 = vstv %s80_s5 }
  0x4f   : > { %v88_v32 = vsub.f32 %v151_v11, %v87_v31  ;;  %v99_v39 = vstv %s82_s8 }
  0x50   : > { %v89_v33 = vmul.f32 %v86_v30, %v86_v30  ;;  %v101_v42 = vstv %s84_s9 }
  0x51   : > { %v90_v34 = vmul.f32 %v88_v32, %v88_v32 }
  0x53   : > { %v91_v35 = vadd.f32 %v90_v34, %v89_v33 }
  0x55   : > { %191 = vrsqrt.f32 %v91_v35  ;;  %vm94_vm2 = vcmp.eq.f32.partialorder %v91_v35, inf  ;;  %v97_v37 = vand.u32 2147483648, %v91_v35  ;;  %vm96_vm3 = vcmp.eq.f32.partialorder %v91_v35, 0.0 }
  0x5f   : > { %v192_v36 = vpop.eup %191 }
  0x60   : > { %v93_v38 = vmul.f32 %v192_v36, %v91_v35 }
  0x62   : > { %v95_v40 = vsel %vm94_vm2, %v91_v35, %v93_v38 }
  0x63   : > { %v98_v41 = vsel %vm96_vm3, %v97_v37, %v95_v40 }
  0x64   : > { %v100_v43 = vmul.f32 %v99_v39, %v98_v41  ;;  %75 = sbr.rel (!%p72_p6) target bundleno = 70 (0x46), region = 51 }
  0x66   : > { %v102_v44 = vadd.f32 %v101_v42, %v100_v43 }
  0x68   : > { %v103_v45 = vmax.f32 %v247_v28, %v102_v44  }
  0x6a   : > { %v246_v28 = vmov %v103_v45   ;;  %v254_v27 = vmov (%p72_p6), %v103_v45  }
  0x6b PF:  { %v104_v46 = vmul.f32 1.442695, %v255_v27  ;;  %v107_v48 = vstv %s34_s22  ;;  %v110_v49 = vstv %s35_s24  ;;  %v113_v52 = vld [vmem:[%s342_s3] sm:$0x3]  ;;  %v157_v54 = vld [vmem:[%s342_s3 + $0x2] sm:$0x3]  ;;  %v255_v27 = vphi %v253_v27, %v254_v27  }
  0x6c   :  { %v158_v55 = vld [vmem:[%s342_s3 + $0x4] sm:$0x3]  ;;  %s258_s21 = smov [#allocation7]  }
  0x6d   :  { %193 = vpow2.f32 %v104_v46  ;;  %s131_s22 = sshll.u32 %s258_s21, 4  ;;  %s132_s22 = int_to_ptr.vmem [resolvable:$true] %s131_s22 }
  0x6e   :  { %s207_s2 = scalar_lea.vmem %s132_s22, 96  ;;  %p212_p8 = scmp.lt.s32.totalorder %s132_s22, %s132_s22 }
  0x6f   :  { %p208_p7 = scmp.ne.s32.totalorder %s132_s22, %s207_s2  ;;  %p213_p9 = scmp.lt.s32.totalorder %s207_s2, %s207_s2 }
  0x71   :  { %p214_p10 = por %p213_p9, %p212_p8 }
  0x73   :  { %p215_p11 = pnand %p214_p10, %p208_p7 }
  0x77   :  { %v194_v47 = vpop.eup %193 }
  0x78   :  { %v106_v50 = vmax.f32 %v68_v26, %v194_v47 }
  0x7a   :  { %v108_v51 = vmul.f32 %v107_v48, %v106_v50  ;;  %v111_v53 = vmul.f32 %v110_v49, %v106_v50 }
  0x7c   :  { %v109_v56 = vsub.f32 1.0, %v108_v51  ;;  %v112_v57 = vsub.f32 1.0, %v111_v53 }
  0x7e   :  { %v114_v58 = vmul.f32 %v113_v52, %v109_v56  ;;  %v118_v59 = vmul.f32 %v157_v54, %v112_v57  ;;  %v123_v60 = vmul.f32 %v158_v55, %v112_v57 }
  0x80   :  { %115 = vst [vmem:[#allocation7] sm:$0x3] %v114_v58  ;;  %120 = vst [vmem:[#allocation7 + $0x2] sm:$0x3] %v118_v59 }
  0x81   :  { %125 = vst [vmem:[#allocation7 + $0x4] sm:$0x3] %v123_v60 }
  0x82   :  { %218 = shalt.err (!%p215_p11)
}
  0x83   :  { %s219_s0 = scalar_lea.hbm %s343_s4, 96 }
  0x84   :  { %p220_p12 = scmp.ne.s32.totalorder %s343_s4, %s219_s0  ;;  %p223_p13 = scmp.lt.u32.totalorder %s219_s0, %s343_s4 }
  0x86   :  { %p225_p0 = pnand %p223_p13, %p220_p12 }
  0x88   :  { %228 = shalt.err (!%p225_p0)
}
  0x89   :  { %s259_s28 = smov 32   ;;  %s260_s29 = smov 2  }
  0x8a   :  { %137 = dma.vmem_to_hbm [thread:$0]  %s132_s22, 96, %s343_s4, [#allocation5], %s259_s28, %s259_s28, %s260_s29  }
  0x8b   :  { %243 = dma.done.wait [#allocation5], 96  }
  0x8c   :  { %244 = vsyncadd [#allocation5], 4294967200 }
  0x8d   :  { %141 = vsyncpa [#allocation5], 1 }
  0x8e   :  { %142 = vsyncpa [#allocation6], 1 }

</bundles_post_ra>
